<compile_context>
chip_gen: v6e
topology: v6e:2x2x1
jax: 0.10.0
libtpu: 0.0.40
codegen_flags: <defaults>
</compile_context>

<pallas_src>
import jax
import jax.numpy as jnp
from jax import lax
from jax.experimental import pallas as pl
from jax.experimental.pallas import tpu as pltpu


def _round_up(x: int, m: int) -> int:
    return (x + m - 1) // m * m


def skipgram_kernel(u_ref, v_ref, out_ref):
    # u_ref  : (TB, D)  tile of gathered u-embedding rows (compute dtype).
    # v_ref  : (TV, D)  contiguous rows of the v-embedding table (compute dtype).
    # out_ref: (TB, TV) tile of the score matrix.
    # Contract on the last dim of both operands (== u @ v.T) so the RHS tile
    # arrives in its native, contiguous (V, D) layout -- no transposes.
    out_ref[...] = lax.dot_general(
        u_ref[...],
        v_ref[...],
        dimension_numbers=(((1,), (1,)), ((), ())),
        preferred_element_type=jnp.float32,
    ).astype(out_ref.dtype)


def skipgram_forward(
    target_words,
    u_weight,
    v_weight,
    *,
    tb=None,
    tv=2048,
    compute_dtype=jnp.bfloat16,
    out_dtype=jnp.float32,
    v_buffers=None,
):
    """scores[b, :] = u_weight[target_words[b]] @ v_weight.T."""
    V, D = u_weight.shape
    assert v_weight.shape == (V, D)
    B = int(target_words.shape[0])

    # Gather the u rows in the wrapper (B x D is tiny vs. the v stream) and
    # cast inputs to the compute dtype.  bf16 halves HBM traffic on this
    # bandwidth-bound op; pass compute_dtype=jnp.float32 for exact f32 parity
    # with the PyTorch forward.
    u_embeds = jnp.take(u_weight, target_words.astype(jnp.int32), axis=0)
    u_embeds = u_embeds.astype(compute_dtype)
    v = v_weight.astype(compute_dtype)  # (V, D): fed as-is, no transpose pass.

    # ---- tile selection -------------------------------------------------
    # Vocab tile: lane-dense multiple of 128, 2-4K wide to amortize the
    # ~0.35 us/step overhead; capped at 4096 to stay comfortable in v7x's
    # 64 MiB VMEM once double-buffering is counted.
    tv = min(tv, 4096, _round_up(V, 128))
    # Batch tile: multiple of 16 (bf16 sublane packing).  Small B -> tightest
    # multiple of 16; large B -> {128, 256} candidate minimizing padded rows
    # (padding is pure wasted output writeback).
    if tb is None:
        if B <= 256:
            tb = _round_up(B, 16)
        else:
            tb = min((128, 256), key=lambda t: _round_up(B, t) - B)
    else:
        tb = max(16, _round_up(min(tb, _round_up(B, 16)), 16))

    Bp = _round_up(B, tb)
    Vp = _round_up(V, tv)
    if Bp != B:
        u_embeds = jnp.pad(u_embeds, ((0, Bp - B), (0, 0)))
    if Vp != V:
        v = jnp.pad(v, ((0, Vp - V), (0, 0)))

    v_spec_kwargs = {}
    if v_buffers is not None:
        # v5e knob: deeper pipelining on the v stream if the DMA is exposed.
        v_spec_kwargs["pipeline_mode"] = pl.Buffered(v_buffers)

    # Grid: vocab axis OUTERMOST (shardable across v7x's two TensorCores with
    # disjoint v tiles), batch axis INNERMOST (v block index is constant
    # across consecutive steps -> Pallas skips the re-DMA; v is read from HBM
    # exactly once per forward).
    grid = (Vp // tv, Bp // tb)

    out = pl.pallas_call(
        skipgram_kernel,
        out_shape=jax.ShapeDtypeStruct((Bp, Vp), out_dtype),
        grid_spec=pltpu.PrefetchScalarGridSpec(
            num_scalar_prefetch=0,
            grid=grid,
            in_specs=[
                # u tile: i-th batch block, full D (K untiled; D fits VMEM).
                pl.BlockSpec((tb, D), lambda j, i: (i, 0)),
                # v tile: j-th vocab block of the (V, D) table -- contiguous
                # slab, block index unchanged across the inner (batch) axis.
                pl.BlockSpec((tv, D), lambda j, i: (j, 0), **v_spec_kwargs),
            ],
            out_specs=pl.BlockSpec((tb, tv), lambda j, i: (i, j)),
        ),
        compiler_params=pltpu.CompilerParams(
            # Every (j, i) writes a distinct output tile (no accumulation).
            # Vocab "parallel" -> megacore splits disjoint v tiles; batch
            # "arbitrary" -> the batch axis is never the one that gets split
            # (splitting it would duplicate the v stream across cores).
            dimension_semantics=("parallel", "arbitrary"),
            vmem_limit_bytes=32 * 1024 * 1024,
        ),
    )(u_embeds, v)
    return out[:B, :V]


if __name__ == "__main__":
    vocab_size = 512
    embedding_dim = 128
    batch_size = 8

    key = jax.random.PRNGKey(0)
    k_u, k_v, k_t = jax.random.split(key, 3)

    # Module init: u ~ U(-0.5/D, 0.5/D), v = zeros.  u is faithful; v uses
    # random values so the numerical check is non-trivial (forward semantics
    # are independent of init values).
    initrange = 0.5 / embedding_dim
    u_weight = jax.random.uniform(
        k_u, (vocab_size, embedding_dim), jnp.float32,
        minval=-initrange, maxval=initrange)
    v_weight = 0.5 * jax.random.normal(
        k_v, (vocab_size, embedding_dim), dtype=jnp.float32)

    target_words = jax.random.randint(
        k_t, (batch_size,), 0, vocab_size, dtype=jnp.int32)

    scores = jax.block_until_ready(
        skipgram_forward(target_words, u_weight, v_weight))
    assert scores.shape == (batch_size, vocab_size)
    assert scores.dtype == jnp.float32

    # Tight check against the same bf16-input / f32-accumulate computation.
    u_bf = jnp.take(u_weight, target_words, axis=0).astype(jnp.bfloat16)
    v_bf = v_weight.astype(jnp.bfloat16)
    ref_bf16 = lax.dot_general(
        u_bf, v_bf, (((1,), (1,)), ((), ())),
        preferred_element_type=jnp.float32)
    assert jnp.allclose(scores, ref_bf16, atol=1e-5, rtol=1e-3)

    # Loose sanity check against the full-f32 PyTorch-equivalent forward
    # (accounts for the deliberate bf16 input quantization).
    ref_f32 = jnp.take(u_weight, target_words, axis=0) @ v_weight.T
    assert jnp.allclose(scores, ref_f32, atol=1e-3, rtol=2e-2)

    # Optional exact-f32 path (compute_dtype=f32) matches the f32 reference.
    scores_f32 = jax.block_until_ready(
        skipgram_forward(target_words, u_weight, v_weight,
                         compute_dtype=jnp.float32))
    assert jnp.allclose(scores_f32, ref_f32, atol=1e-5, rtol=1e-5)

    print("KERNEL_OK")
</pallas_src>

<mosaic_0001>
module attributes {stable_mosaic.version = 11 : i64} {
  func.func @skipgram_kernel(%arg0: i32, %arg1: i32, %arg2: memref<16x128xbf16, #tpu.memory_space<vmem>>, %arg3: memref<512x128xbf16, #tpu.memory_space<vmem>>, %arg4: memref<16x512xf32, #tpu.memory_space<vmem>>) attributes {dimension_semantics = [#tpu.dimension_semantics<parallel>, #tpu.dimension_semantics<arbitrary>], iteration_bounds = array<i64: 1, 1>, scalar_prefetch = 0 : i64, scratch_operands = 0 : i64, tpu.core_type = #tpu.core_type<tc>, window_params = [{transform_indices = @transform_0, window_bounds = array<i64: 16, 128>}, {transform_indices = @transform_1, window_bounds = array<i64: 512, 128>}, {transform_indices = @transform_2, window_bounds = array<i64: 16, 512>}]} {
    %c0 = arith.constant 0 : index
    %c0_0 = arith.constant 0 : index
    %0 = vector.load %arg2[%c0, %c0_0] : memref<16x128xbf16, #tpu.memory_space<vmem>>, vector<16x128xbf16>
    %c0_1 = arith.constant 0 : index
    %c0_2 = arith.constant 0 : index
    %1 = vector.load %arg3[%c0_1, %c0_2] : memref<512x128xbf16, #tpu.memory_space<vmem>>, vector<512x128xbf16>
    %cst = arith.constant dense<0.000000e+00> : vector<16x512xf32>
    %2 = tpu.matmul %0, %1, %cst {dimension_numbers = #tpu.dot_dimension_numbers<[1], [1], [0], [0], [0, 0, 1, 0], [], []>} : vector<16x128xbf16>, vector<512x128xbf16>, vector<16x512xf32> -> vector<16x512xf32>
    %c0_3 = arith.constant 0 : index
    %c0_4 = arith.constant 0 : index
    %3 = vector.load %arg4[%c0_3, %c0_4] : memref<16x512xf32, #tpu.memory_space<vmem>>, vector<16x512xf32>
    tpu.vector_store %arg4[%c0_3, %c0_4], %2 {strides = array<i32>} : memref<16x512xf32, #tpu.memory_space<vmem>>, vector<16x512xf32>,
    return
  }
  func.func @transform_0(%arg0: i32, %arg1: i32) -> (i32, i32) {
    %c0_i32 = arith.constant 0 : i32
    %c0_i32_0 = arith.constant 0 : i32
    return %arg1, %c0_i32 : i32, i32
  }
  func.func @transform_1(%arg0: i32, %arg1: i32) -> (i32, i32) {
    %c0_i32 = arith.constant 0 : i32
    %c0_i32_0 = arith.constant 0 : i32
    return %arg0, %c0_i32 : i32, i32
  }
  func.func @transform_2(%arg0: i32, %arg1: i32) -> (i32, i32) {
    %c0_i32 = arith.constant 0 : i32
    return %arg1, %arg0 : i32, i32
  }
}

</mosaic_0001>

<bundles_post_ra>
// kernel: tpu_custom_call.1
= control target key start
LH: loop header
LB: loop body
LE: loop exit
PB: predicated region body
PF: predicated region fallthrough
CT: control target
= control target key end

     0   :  { %7 = vsyncpa [#allocation3], 0  ;;  %s623_s0 = inlined_call_operand.hbm [shape: bf16[16,128], index: 0, kind: input, shape index: {}]   ;;  %s624_s1 = inlined_call_operand.hbm [shape: bf16[512,128], index: 1, kind: input, shape index: {}]   ;;  %s625_s2 = inlined_call_operand.hbm [shape: f32[16,512], index: 2, kind: output, shape index: {}]  }
   0x1   :  { %8 = vsyncpa [#allocation6], 0 }
   0x2   :  { %9 = vsyncpa [#allocation4], 0  ;;  %s592_s9 = smov [#allocation2]  }
   0x3   :  { %s15_s10 = sshll.u32 %s592_s9, 4  ;;  %s16_s10 = int_to_ptr.vmem [resolvable:$true] %s15_s10 }
   0x4   :  { %s534_s11 = scalar_lea.vmem %s16_s10, 128  ;;  %p539_p1 = scmp.lt.s32.totalorder %s16_s10, %s16_s10 }
   0x5   :  { %p535_p0 = scmp.ne.s32.totalorder %s16_s10, %s534_s11  ;;  %p540_p2 = scmp.lt.s32.totalorder %s534_s11, %s534_s11 }
   0x7   :  { %p541_p3 = por %p540_p2, %p539_p1 }
   0x9   :  { %p542_p4 = pnand %p541_p3, %p535_p0 }
   0xb   :  { %545 = shalt.err (!%p542_p4)
}
   0xc   :  { %s593_s12 = smov 64   ;;  %s594_s13 = smov 4  }
   0xd   :  { %21 = dma.hbm_to_vmem [thread:$0]  %s623_s0, 128, %s16_s10, [#allocation3], %s593_s12, %s593_s12, %s594_s13  }
   0xe   :  { %s595_s16 = smov [#allocation5]  }
   0xf   :  { %s27_s17 = sshll.u32 %s595_s16, 4  ;;  %s28_s17 = int_to_ptr.vmem [resolvable:$true] %s27_s17 }
  0x10   :  { %s554_s18 = scalar_lea.vmem %s28_s17, 4096  ;;  %p559_p6 = scmp.lt.s32.totalorder %s28_s17, %s28_s17 }
  0x11   :  { %p555_p5 = scmp.ne.s32.totalorder %s28_s17, %s554_s18  ;;  %p560_p7 = scmp.lt.s32.totalorder %s554_s18, %s554_s18 }
  0x13   :  { %p561_p8 = por %p560_p7, %p559_p6 }
  0x15   :  { %p562_p9 = pnand %p561_p8, %p555_p5 }
  0x17   :  { %565 = shalt.err (!%p562_p9)
}
  0x18   :  { %33 = dma.hbm_to_vmem [thread:$0]  %s624_s1, 4096, %s28_s17, [#allocation6], %s593_s12, %s593_s12, %s594_s13  }
  0x19   :  { %586 = dma.done.wait [#allocation3], 128  }
  0x1a   :  { %587 = vsyncadd [#allocation3], 4294967168 }
  0x1b   :  { %588 = dma.done.wait [#allocation6], 4096  }
  0x1c   :  { %589 = vsyncadd [#allocation6], 4294963200  ;;  %v493_v0 = vld [vmem:[#allocation5 + $0x78] sm:$0xff]   ;;  %v497_v4 = vld [vmem:[#allocation5 + $0x70] sm:$0xff]   ;;  %s596_s0 = smov [#allocation7]  }
  0x1d   :  { %v494_v1 = vld [vmem:[#allocation5 + $0xf8] sm:$0xff]   ;;  %450 = vmatprep.subr.bf16.mxu0 %v493_v0  ;;  %v498_v5 = vld [vmem:[#allocation5 + $0xf0] sm:$0xff]   ;;  %v501_v8 = vld [vmem:[#allocation5 + $0x68] sm:$0xff]   ;;  %s404_s1 = sshll.u32 %s596_s0, 4  ;;  %s405_s1 = int_to_ptr.vmem [resolvable:$true] %s404_s1 }
  0x1e   :  { %v495_v2 = vld [vmem:[#allocation5 + $0x38] sm:$0xff]   ;;  %468 = vmatprep.subr.bf16.mxu1 %v494_v1  ;;  %v499_v6 = vld [vmem:[#allocation5 + $0x30] sm:$0xff]   ;;  %v502_v9 = vld [vmem:[#allocation5 + $0xe8] sm:$0xff]   ;;  %s566_s21 = scalar_lea.vmem %s405_s1, 1024  ;;  %p571_p11 = scmp.lt.s32.totalorder %s405_s1, %s405_s1 }
  0x1f   :  { %v496_v3 = vld [vmem:[#allocation5 + $0xb8] sm:$0xff]   ;;  %451 = vmatpush3.bf16.xpose.msra.mxu0 %v495_v2  ;;  %v500_v7 = vld [vmem:[#allocation5 + $0xb0] sm:$0xff]   ;;  %v503_v10 = vld [vmem:[#allocation5 + $0x28] sm:$0xff]   ;;  %p567_p10 = scmp.ne.s32.totalorder %s405_s1, %s566_s21  ;;  %p572_p12 = scmp.lt.s32.totalorder %s566_s21, %s566_s21 }
  0x20   :  { %469 = vmatpush3.bf16.xpose.msra.mxu1 %v496_v3  ;;  %452 = vmatprep.subr.bf16.mxu0 %v497_v4  ;;  %v504_v11 = vld [vmem:[#allocation5 + $0xa8] sm:$0xff]   ;;  %v505_v12 = vld [vmem:[#allocation5 + $0x60] sm:$0xff]   ;;  %v509_v16 = vld [vmem:[#allocation5 + $0x58] sm:$0xff]  }
  0x21   :  { %470 = vmatprep.subr.bf16.mxu1 %v498_v5  ;;  %v506_v13 = vld [vmem:[#allocation5 + $0xe0] sm:$0xff]   ;;  %v510_v17 = vld [vmem:[#allocation5 + $0xd8] sm:$0xff]   ;;  %v513_v21 = vld [vmem:[#allocation5 + $0x50] sm:$0xff]   ;;  %p573_p13 = por %p572_p12, %p571_p11 }
  0x22   :  { %v507_v14 = vld [vmem:[#allocation5 + $0x20] sm:$0xff]   ;;  %v511_v18 = vld [vmem:[#allocation5 + $0x18] sm:$0xff]   ;;  %v514_v22 = vld [vmem:[#allocation5 + $0xd0] sm:$0xff]  }
  0x23   :  { %v508_v15 = vld [vmem:[#allocation5 + $0xa0] sm:$0xff]   ;;  %v525_v19 = vld [vmem:[#allocation2] sm:$0xff]   ;;  %v515_v23 = vld [vmem:[#allocation5 + $0x10] sm:$0xff]   ;;  %p574_p0 = pnand %p573_p13, %p567_p10 }
  0x24   :  { %v512_v20 = vld [vmem:[#allocation5 + $0x98] sm:$0xff]   ;;  %466 = vmatprep.mubr.bf16.mxu0 %v525_v19  ;;  %484 = vmatprep.mubr.bf16.mxu1 %v525_v19  ;;  %v516_v24 = vld [vmem:[#allocation5 + $0x90] sm:$0xff]   ;;  %v517_v25 = vld [vmem:[#allocation5 + $0x48] sm:$0xff]  }
  0x25   :  { %v518_v26 = vld [vmem:[#allocation5 + $0xc8] sm:$0xff]   ;;  %v521_v29 = vld [vmem:[#allocation5 + $0x40] sm:$0xff]  }
  0x26   :  { %v519_v27 = vld [vmem:[#allocation5 + $0x8] sm:$0xff]   ;;  %v522_v30 = vld [vmem:[#allocation5 + $0xc0] sm:$0xff]  }
  0x27   :  { %453 = vmatpush3.bf16.xpose.msra.mxu0 %v499_v6  ;;  %v520_v28 = vld [vmem:[#allocation5 + $0x88] sm:$0xff]   ;;  %v523_v31 = vld [vmem:[#allocation5] sm:$0xff]  }
  0x28   :  { %471 = vmatpush3.bf16.xpose.msra.mxu1 %v500_v7  ;;  %454 = vmatprep.subr.bf16.mxu0 %v501_v8  ;;  %v524_v32 = vld [vmem:[#allocation5 + $0x80] sm:$0xff]  }
  0x29   :  { %472 = vmatprep.subr.bf16.mxu1 %v502_v9 }
  0x2f   :  { %455 = vmatpush3.bf16.xpose.msra.mxu0 %v503_v10 }
  0x30   :  { %473 = vmatpush3.bf16.xpose.msra.mxu1 %v504_v11  ;;  %456 = vmatprep.subr.bf16.mxu0 %v505_v12 }
  0x31   :  { %474 = vmatprep.subr.bf16.mxu1 %v506_v13 }
  0x37   :  { %457 = vmatpush3.bf16.xpose.msra.mxu0 %v507_v14 }
  0x38   :  { %475 = vmatpush3.bf16.xpose.msra.mxu1 %v508_v15  ;;  %458 = vmatprep.subr.bf16.mxu0 %v509_v16 }
  0x39   :  { %476 = vmatprep.subr.bf16.mxu1 %v510_v17 }
  0x3f   :  { %459 = vmatpush3.bf16.xpose.msra.mxu0 %v511_v18 }
  0x40   :  { %477 = vmatpush3.bf16.xpose.msra.mxu1 %v512_v20  ;;  %460 = vmatprep.subr.bf16.mxu0 %v513_v21 }
  0x41   :  { %478 = vmatprep.subr.bf16.mxu1 %v514_v22 }
  0x47   :  { %461 = vmatpush3.bf16.xpose.msra.mxu0 %v515_v23 }
  0x48   :  { %479 = vmatpush3.bf16.xpose.msra.mxu1 %v516_v24  ;;  %462 = vmatprep.subr.bf16.mxu0 %v517_v25 }
  0x49   :  { %480 = vmatprep.subr.bf16.mxu1 %v518_v26 }
  0x4f   :  { %463 = vmatpush3.bf16.xpose.msra.mxu0 %v519_v27 }
  0x50   :  { %481 = vmatpush3.bf16.xpose.msra.mxu1 %v520_v28  ;;  %464 = vmatprep.subr.bf16.mxu0 %v521_v29 }
  0x51   :  { %482 = vmatprep.subr.bf16.mxu1 %v522_v30 }
  0x57   :  { %465 = vmatpush3.bf16.xpose.msra.mxu0 %v523_v31 }
  0x58   :  { %483 = vmatpush3.bf16.xpose.msra.mxu1 %v524_v32 }
  0x5e   :  { %467 = vmatmul.mubr.bf16.vlgmr.msra.gmra.mxu0 %v525_v19 }
  0x5f   :  { %485 = vmatmul.mubr.bf16.vlgmr.msra.gmra.mxu1 %v525_v19 }
 0x11e   :  { %v339_v33 = vpop.f32.mrf.mxu0 }
 0x11f   :  { %391 = vst [vmem:[#allocation7] sm:$0xff] %v339_v33  ;;  %v382_v34 = vpop.f32.mrf.mxu1 }
 0x120   :  { %393 = vst [vmem:[#allocation7 + $0x10] sm:$0xff] %v382_v34  ;;  %v341_v35 = vpop.f32.mrf.mxu0 }
 0x121   :  { %392 = vst [vmem:[#allocation7 + $0x8] sm:$0xff] %v341_v35  ;;  %v384_v36 = vpop.f32.mrf.mxu1 }
 0x122   :  { %394 = vst [vmem:[#allocation7 + $0x18] sm:$0xff] %v384_v36  ;;  %v343_v37 = vpop.f32.mrf.mxu0 }
 0x123   :  { %395 = vst [vmem:[#allocation7 + $0x20] sm:$0xff] %v343_v37  ;;  %v386_v38 = vpop.f32.mrf.mxu1 }
 0x124   :  { %397 = vst [vmem:[#allocation7 + $0x30] sm:$0xff] %v386_v38  ;;  %v345_v39 = vpop.f32.mrf.mxu0 }
 0x125   :  { %396 = vst [vmem:[#allocation7 + $0x28] sm:$0xff] %v345_v39  ;;  %v388_v40 = vpop.f32.mrf.mxu1 }
 0x126   :  { %398 = vst [vmem:[#allocation7 + $0x38] sm:$0xff] %v388_v40 }
 0x127   :  { %577 = shalt.err (!%p574_p0)
}
 0x128   :  { %s597_s22 = smov 512   ;;  %s598_s23 = smov 32  }
 0x129   :  { %410 = dma.vmem_to_hbm [thread:$0]  %s405_s1, 1024, %s625_s2, [#allocation4], %s597_s22, %s597_s22, %s598_s23  }
 0x12a   :  { %590 = dma.done.wait [#allocation4], 1024  }
 0x12b   :  { %591 = vsyncadd [#allocation4], 4294966272 }
 0x12c   :  { %414 = vsyncpa [#allocation3], 1 }
 0x12d   :  { %415 = vsyncpa [#allocation6], 1 }
 0x12e   :  { %416 = vsyncpa [#allocation4], 1 }

</bundles_post_ra>
